<compile_context>
chip_gen: v7x
topology: tpu7x:2x2x1
jax: 0.10.0
libtpu: 0.0.40
codegen_flags: <defaults>
</compile_context>

<pallas_src>
import numpy as np
import jax
import jax.numpy as jnp
from jax import lax
from jax.experimental import pallas as pl
from jax.experimental.pallas import tpu as pltpu

EPS = 1e-5
INTER_CHANS = 32           # module default
OUT_CHANS = 1
IN_CHANS = 1               # forced by the module (assert + final 1x1 conv on 2 channels)
DILATION2 = 3              # module default for up2's DoubleConv

H_IN = W_IN = 16
H_OUT = W_OUT = 256
TH = 128                   # output rows per grid step (256/128 = 2 strips per image)


# ----------------------------------------------------------------------------------------------
# 1-D linear interpolation matrix (align_corners=True); built with numpy at trace time.
# ----------------------------------------------------------------------------------------------
def _interp_matrix(n_in, n_out):
    A = np.zeros((n_out, n_in), dtype=np.float32)
    scale = (n_in - 1) / (n_out - 1) if n_out > 1 else 0.0
    for i in range(n_out):
        src = i * scale
        i0 = min(int(np.floor(src)), n_in - 1)
        i1 = min(i0 + 1, n_in - 1)
        frac = src - i0
        A[i, i0] += 1.0 - frac
        A[i, i1] += frac
    return A


# ----------------------------------------------------------------------------------------------
# Exact trace-time fold of the x-independent branch into one (256,256) constant tail map.
# Every pixel's value depends only on its row / col distance to the borders (capped at 2*d),
# so the full map is the expansion of a (4*d+1)^2 representative image by static indices.
# ----------------------------------------------------------------------------------------------
def _constant_tail_map(p, inter_chans, dilation):
    d = int(dilation)
    hs = 4 * d + 1                                             # representative image size

    # up1: DoubleConv(1, C, mid=0) -> conv2 output is bias-only -> BN -> SiLU (per-channel const)
    y = (p['up1_c2_b'] - p['up1_bn2_rm']) * (p['up1_bn2_g'] * lax.rsqrt(p['up1_bn2_rv'] + EPS)) \
        + p['up1_bn2_b']
    y = y * jax.nn.sigmoid(y)                                  # (inter,)
    # (the Upsample(x4) of x feeding up1 is dead; the Upsample(x4) of this constant is identity.)

    def conv_bn_silu(v, w, b, g, beta, rm, rv):
        v = lax.conv_general_dilated(v, w, window_strides=(1, 1),
                                     padding=[(d, d), (d, d)], rhs_dilation=(d, d),
                                     dimension_numbers=('NCHW', 'OIHW', 'NCHW'))
        v = v + b[None, :, None, None]
        v = (v - rm[None, :, None, None]) * (g * lax.rsqrt(rv + EPS))[None, :, None, None] \
            + beta[None, :, None, None]
        return v * jax.nn.sigmoid(v)                           # SiLU

    y_img = jnp.broadcast_to(y[None, :, None, None], (1, inter_chans, hs, hs))
    h1 = conv_bn_silu(y_img, p['up2_c1_w'], p['up2_c1_b'],
                      p['up2_bn1_g'], p['up2_bn1_b'], p['up2_bn1_rm'], p['up2_bn1_rv'])
    h2 = conv_bn_silu(h1, p['up2_c2_w'], p['up2_c2_b'],
                      p['up2_bn2_g'], p['up2_bn2_b'], p['up2_bn2_rm'], p['up2_bn2_rv'])

    # 1x1 conv (inter -> 1), then the constant part of the final 2->1 conv after the concat.
    z = jnp.einsum('c,chw->hw', p['conv_w'][0, :, 0, 0], h2[0]) + p['conv_b'][0]   # (hs, hs)
    fw0 = p['fconv_w'][0, 0, 0, 0]
    c_small = fw0 * z + p['fconv_b'][0]                                            # (hs, hs)

    # static border-class index map: rows/cols within 2d of an edge keep their own value,
    # every interior row/col shares the value at index 2d.
    idx = np.full((H_OUT,), 2 * d, np.int32)
    idx[:2 * d] = np.arange(2 * d)
    idx[H_OUT - 2 * d:] = hs - 2 * d + np.arange(2 * d)
    idx = jnp.asarray(idx)
    return c_small[idx][:, idx]                                                    # (256, 256)


# ----------------------------------------------------------------------------------------------
# The fused Pallas kernel: one (batch, H-strip) step.  All that is left after the exact folds
# is the x-dependent bilinear upsample (one MXU matmul) and a fused add of the constant map.
# ----------------------------------------------------------------------------------------------
def _decoder_strip_kernel(xw_ref, ah_ref, c_ref, o_ref):
    # xw_ref : (1, 16, 256)   x pre-contracted along W with the column-interp matrix
    # ah_ref : (TH, 16)       row-interp matrix strip, pre-scaled by the final-conv weight fw1
    # c_ref  : (TH, 256)      x-independent constant tail-map strip
    # o_ref  : (1, 1, TH, 256)
    xfd = jnp.dot(ah_ref[...], xw_ref[0], preferred_element_type=jnp.float32)   # (TH, 256) MXU
    o_ref[0, 0, :, :] = xfd + c_ref[...]


# ----------------------------------------------------------------------------------------------
# Parameters (deterministic, synthetic) — module-default inter_chans=32.
# ----------------------------------------------------------------------------------------------
def init_params(key, inter_chans=INTER_CHANS, out_chans=OUT_CHANS):
    ks = jax.random.split(key, 20)
    nrm = lambda k, shape, s=0.2: s * jax.random.normal(k, shape, jnp.float32)
    mid2 = inter_chans // 2
    p = {
        # up1.conv: conv1 is Conv2d(1, 0, 3) -> empty; only conv2 bias + BN2 matter.
        'up1_c2_b': nrm(ks[0], (inter_chans,), 0.3),
        'up1_bn2_g': 1.0 + nrm(ks[1], (inter_chans,), 0.1),
        'up1_bn2_b': nrm(ks[2], (inter_chans,), 0.1),
        'up1_bn2_rm': nrm(ks[3], (inter_chans,), 0.1),
        'up1_bn2_rv': 1.0 + jnp.abs(nrm(ks[4], (inter_chans,), 0.1)),
        # up2.conv = DoubleConv(inter, inter, inter//2, dilation=dilation2)
        'up2_c1_w': nrm(ks[5], (mid2, inter_chans, 3, 3)),
        'up2_c1_b': nrm(ks[6], (mid2,), 0.1),
        'up2_bn1_g': 1.0 + nrm(ks[7], (mid2,), 0.1),
        'up2_bn1_b': nrm(ks[8], (mid2,), 0.1),
        'up2_bn1_rm': nrm(ks[9], (mid2,), 0.1),
        'up2_bn1_rv': 1.0 + jnp.abs(nrm(ks[10], (mid2,), 0.1)),
        'up2_c2_w': nrm(ks[11], (inter_chans, mid2, 3, 3)),
        'up2_c2_b': nrm(ks[12], (inter_chans,), 0.1),
        'up2_bn2_g': 1.0 + nrm(ks[13], (inter_chans,), 0.1),
        'up2_bn2_b': nrm(ks[14], (inter_chans,), 0.1),
        'up2_bn2_rm': nrm(ks[15], (inter_chans,), 0.1),
        'up2_bn2_rv': 1.0 + jnp.abs(nrm(ks[16], (inter_chans,), 0.1)),
        # 1x1 convs
        'conv_w': nrm(ks[17], (out_chans, inter_chans, 1, 1)),
        'conv_b': nrm(ks[18], (out_chans,), 0.1),
        'fconv_w': nrm(ks[19], (1, 2, 1, 1)),
        'fconv_b': jnp.array([0.05], jnp.float32),
    }
    return p


# ----------------------------------------------------------------------------------------------
# Decoder forward: exact constant folding in JAX, then one fused pallas_call.
# ----------------------------------------------------------------------------------------------
def decoder_forward(x, p, inter_chans=INTER_CHANS, dilation2=DILATION2):
    N = x.shape[0]
    x = x.astype(jnp.float32)

    # x-independent branch (up1 const -> dilated up2 DoubleConv -> 1x1 conv -> final-conv
    # constants), folded exactly into one (256, 256) map.
    cmap = _constant_tail_map(p, inter_chans, dilation2)

    # bilinear-upsample matrices (align_corners=True); fold the final-conv weight on the
    # x_final_dec channel into the row matrix; pre-contract x along W (lane-dense operand).
    A_h = jnp.asarray(_interp_matrix(H_IN, H_OUT))             # (256, 16)
    A_w = jnp.asarray(_interp_matrix(W_IN, W_OUT).T)           # (16, 256)
    fw1 = p['fconv_w'][0, 1, 0, 0]
    ah = fw1 * A_h                                             # (256, 16)
    xw = jnp.einsum('nij,jw->niw', x[:, 0], A_w)               # (N, 16, 256)

    return pl.pallas_call(
        _decoder_strip_kernel,
        out_shape=jax.ShapeDtypeStruct((N, 1, H_OUT, W_OUT), jnp.float32),
        grid=(N, H_OUT // TH),
        in_specs=[
            pl.BlockSpec((1, H_IN, W_OUT), lambda n, h: (n, 0, 0)),    # xw per batch
            pl.BlockSpec((TH, H_IN), lambda n, h: (h, 0)),             # scaled A_h strip
            pl.BlockSpec((TH, W_OUT), lambda n, h: (h, 0)),            # constant tail strip
        ],
        out_specs=pl.BlockSpec((1, 1, TH, W_OUT), lambda n, h: (n, 0, h, 0)),
        compiler_params=pltpu.CompilerParams(
            dimension_semantics=("parallel", "parallel")),
    )(xw, ah, cmap)


if __name__ == "__main__":
    key = jax.random.PRNGKey(0)
    kx, kp = jax.random.split(key)
    x = jax.random.normal(kx, (2, IN_CHANS, H_IN, W_IN), jnp.float32)     # [N, 1, 16, 16]
    params = init_params(kp)

    fwd = jax.jit(decoder_forward)
    out = jax.block_until_ready(fwd(x, params))

    assert out.shape == (2, 1, 256, 256), out.shape
    assert bool(jnp.all(jnp.isfinite(out)))
    print("KERNEL_OK")
</pallas_src>

<mosaic_0001>
module attributes {stable_mosaic.version = 11 : i64} {
  func.func @_decoder_strip_kernel(%arg0: i32, %arg1: i32, %arg2: memref<1x16x256xf32, #tpu.memory_space<vmem>>, %arg3: memref<128x16xf32, #tpu.memory_space<vmem>>, %arg4: memref<128x256xf32, #tpu.memory_space<vmem>>, %arg5: memref<1x1x128x256xf32, #tpu.memory_space<vmem>>) attributes {dimension_semantics = [#tpu.dimension_semantics<parallel>, #tpu.dimension_semantics<parallel>], iteration_bounds = array<i64: 2, 2>, scalar_prefetch = 0 : i64, scratch_operands = 0 : i64, tpu.core_type = #tpu.core_type<tc>, window_params = [{transform_indices = @transform_0, window_bounds = array<i64: 1, 16, 256>}, {transform_indices = @transform_1, window_bounds = array<i64: 128, 16>}, {transform_indices = @transform_2, window_bounds = array<i64: 128, 256>}, {transform_indices = @transform_3, window_bounds = array<i64: 1, 1, 128, 256>}]} {
    %c0 = arith.constant 0 : index
    %c0_0 = arith.constant 0 : index
    %0 = vector.load %arg3[%c0, %c0_0] : memref<128x16xf32, #tpu.memory_space<vmem>>, vector<128x16xf32>
    %c0_1 = arith.constant 0 : index
    %c0_2 = arith.constant 0 : index
    %c0_3 = arith.constant 0 : index
    %1 = vector.load %arg2[%c0_1, %c0_2, %c0_3] : memref<1x16x256xf32, #tpu.memory_space<vmem>>, vector<1x16x256xf32>
    %2 = vector.shape_cast %1 : vector<1x16x256xf32> to vector<16x256xf32>
    %cst = arith.constant dense<0.000000e+00> : vector<128x256xf32>
    %3 = tpu.matmul %0, %2, %cst {dimension_numbers = #tpu.dot_dimension_numbers<[1], [0], [0], [1], [0, 0, 1, 1], [], []>} : vector<128x16xf32>, vector<16x256xf32>, vector<128x256xf32> -> vector<128x256xf32>
    %c0_4 = arith.constant 0 : index
    %c0_5 = arith.constant 0 : index
    %4 = vector.load %arg4[%c0_4, %c0_5] : memref<128x256xf32, #tpu.memory_space<vmem>>, vector<128x256xf32>
    %5 = arith.addf %3, %4 : vector<128x256xf32>
    %c0_6 = arith.constant 0 : index
    %c0_7 = arith.constant 0 : index
    %c0_8 = arith.constant 0 : index
    %c0_9 = arith.constant 0 : index
    %6 = vector.load %arg5[%c0_6, %c0_7, %c0_8, %c0_9] : memref<1x1x128x256xf32, #tpu.memory_space<vmem>>, vector<1x1x128x256xf32>
    %7 = vector.shape_cast %6 : vector<1x1x128x256xf32> to vector<128x256xf32>
    %8 = vector.shape_cast %5 : vector<128x256xf32> to vector<1x1x128x256xf32>
    tpu.vector_store %arg5[%c0_6, %c0_7, %c0_8, %c0_9], %8 {strides = array<i32>} : memref<1x1x128x256xf32, #tpu.memory_space<vmem>>, vector<1x1x128x256xf32>,
    return
  }
  func.func @transform_0(%arg0: i32, %arg1: i32) -> (i32, i32, i32) {
    %c0_i32 = arith.constant 0 : i32
    %c0_i32_0 = arith.constant 0 : i32
    %c0_i32_1 = arith.constant 0 : i32
    return %arg0, %c0_i32, %c0_i32_0 : i32, i32, i32
  }
  func.func @transform_1(%arg0: i32, %arg1: i32) -> (i32, i32) {
    %c0_i32 = arith.constant 0 : i32
    %c0_i32_0 = arith.constant 0 : i32
    return %arg1, %c0_i32 : i32, i32
  }
  func.func @transform_2(%arg0: i32, %arg1: i32) -> (i32, i32) {
    %c0_i32 = arith.constant 0 : i32
    %c0_i32_0 = arith.constant 0 : i32
    return %arg1, %c0_i32 : i32, i32
  }
  func.func @transform_3(%arg0: i32, %arg1: i32) -> (i32, i32, i32, i32) {
    %c0_i32 = arith.constant 0 : i32
    %c0_i32_0 = arith.constant 0 : i32
    %c0_i32_1 = arith.constant 0 : i32
    return %arg0, %c0_i32, %arg1, %c0_i32_0 : i32, i32, i32, i32
  }
}

</mosaic_0001>

<bundles_post_ra>
// kernel: decoder_forward.1
= control target key start
LH: loop header
LB: loop body
LE: loop exit
PB: predicated region body
PF: predicated region fallthrough
CT: control target
= control target key end

     0   :  { %8 = vsyncpa [#allocation3], 0  ;;  %s1137_s0 = inlined_call_operand.vmem [shape: f32[2,16,256], index: 0, kind: input, shape index: {}]   ;;  %s1138_s1 = inlined_call_operand.vmem [shape: f32[256,16], index: 1, kind: input, shape index: {}]   ;;  %s1139_s2 = inlined_call_operand.vmem [shape: f32[256,256], index: 2, kind: input, shape index: {}]   ;;  %s1140_s3 = inlined_call_operand.hbm [shape: f32[2,1,256,256], index: 3, kind: output, shape index: {}]  }
   0x1   :  { %10 = vsyncpa [#allocation3 + $0x1], 0  ;;  %s881_s12 = smov 0   ;;  %s883_s13 = smov 0  }
   0x2   :  { %s885_s14 = smov 0   ;;  %s887_s15 = smov 0  }
   0x3   :  { %s889_s16 = smov 0   ;;  %s891_s17 = smov 0  }
   0x4   :  { %s893_s18 = smov 0   ;;  %s895_s19 = smov 0  }
   0x5 LB: > { %s642_s20 = sadd.s32 4294967295, %s855_s19   ;;  %s643_s21 = sadd.s32 4294967294, %s855_s19   ;;  %s855_s19 = sphi %s895_s19, %s16_s19   ;;  %s851_s18 = sphi %s893_s18, %s1149_s18   ;;  %s847_s17 = sphi %s891_s17, %s1148_s17   ;;  %s843_s16 = sphi %s889_s16, %s1147_s16   ;;  %s839_s15 = sphi %s887_s15, %s1146_s15   ;;  %s835_s14 = sphi %s885_s14, %s1145_s14   ;;  %s831_s13 = sphi %s883_s13, %s1144_s13   ;;  %s827_s12 = sphi %s881_s12, %s1143_s12  }
   0x6   : > { %s25_s22 = sadd.s32 1, %s847_s17  ;;  %s28_s23 = sadd.s32 1, %s851_s18 }
   0x7   : > { %p26_p0 = scmp.ge.s32.totalorder %s25_s22, 2  ;;  %p125_p1 = scmp.ne.s32.totalorder %s835_s14, %s831_s13 }
   0x8   : > { %p126_p2 = scmp.eq.s32.totalorder %s642_s20, 3  ;;  %p131_p5 = scmp.ne.s32.totalorder %s831_s13, %s827_s12 }
   0x9   : > { %s1151_s22 = smov (%p26_p0, %s25_s22), 0  ;;  %s1153_s23 = smov (!%p26_p0, %s28_s23), %s851_s18 }
   0xa   : > { %s111_s24 = ssub.s32 %s847_s17, %s1151_s22  ;;  %p932_p3 = por %p126_p2, %p125_p1 }
   0xb   : > { %p30_p4 = scmp.ge.s32.totalorder %s1153_s23, 2  ;;  %p132_p6 = scmp.eq.s32.totalorder %s643_s21, 3 }
   0xc   : > { %p646_p7 = scmp.ge.s32.totalorder %s855_s19, 1  ;;  %p177_p9 = scmp.lt.s32.totalorder %s855_s19, 5 }
   0xd   : > { %s1155_s23 = smov (%p30_p4, %s1153_s23), 0  ;;  %p941_p8 = por %p132_p6, %p131_p5 }
   0xe   : > { %s110_s27 = ssub.s32 %s851_s18, %s1155_s23  ;;  %s115_s28 = sadd.s32 1, %s835_s14 }
   0xf   : > { %s112_s29 = sor.u32 %s111_s24, %s110_s27  ;;  %p178_p10 = pnand %p646_p7, %p177_p9 }
  0x10   : > { %p113_p11 = scmp.eq.s32.totalorder %s112_s29, 0  ;;  %p212_p12 = scmp.lt.s32.totalorder (!%p178_p10), %s843_s16, 1  ;;  %v857_v0 = vmov (!%p178_p10), 0.0   ;;  %vm283_vm0 = vcmask (!%p178_p10), 130048  }
  0x11   : > { %181 = sbr.rel (%p178_p10) target bundleno = 293 (0x125), region = 32  ;;  %s650_s4 = sshll.u32 (!%p178_p10), %s839_s15, 4  ;;  %396 = vmatprep.mubr.f32.mxu0 (!%p178_p10), %v857_v0  ;;  %444 = vmatprep.mubr.f32.mxu1 (!%p178_p10), %v857_v0 }
  0x12   : > { %s950_s30 = scalar_select %p113_p11, %s835_s14, %s115_s28  }
  0x13   : > { %p218_p13 = scmp.lt.s32.totalorder (!%p178_p10), %s650_s4, 31  ;;  %s209_s27 = sand.u32 (!%p178_p10), 1, %s831_s13  }
  0x14   : > { %s680_s7 = sshll.u32 (!%p178_p10), %s839_s15, 5  ;;  %s674_s8 = sshll.u32 (!%p178_p10), %s843_s16, 6 }
  0x15   : > { %s858_s28 = smov (!%p178_p10), [#allocation2]  }
  0x16   : > { %s765_s29 = sshll.u32 (!%p178_p10), %s858_s28, 4  ;;  %s766_s29 = int_to_ptr.vmem [resolvable:$false] %s765_s29 }
  0x18   : > { %s213_s5 = scalar_select %p212_p12, %s843_s16, 1 }
  0x19   : > { %s1157_s4 = smov (!%p218_p13, %s650_s4), 31 }
  0x1a   : > { %s678_s6 = sshll.u32 %s213_s5, 5  ;;  %s651_s10 = sshll.u32 %s1157_s4, 3 }
  0x1b   : > { %s216_s9 = scalar_lea.vmem %s1137_s0, %s678_s6  ;;  %s964_s21 = scalar_lea.vmem %s1138_s1, %s651_s10 }
  0x1c   : > { %v248_v1 = vld [vmem:[%s216_s9 + $0x8] sm:$0xff]  ;;  %v250_v2 = vld [vmem:[%s216_s9 + $0x18] sm:$0xff]  ;;  %v247_v3 = vld [vmem:[%s216_s9] sm:$0xff]  ;;  %s679_s24 = sshll.u32 %s1157_s4, 4  ;;  %s647_s6 = sshll.u32 %s209_s27, 8 }
  0x1d   : > { %v681_v4 = vpack.c.bf16 %v250_v2, %v248_v1  ;;  %v249_v5 = vld [vmem:[%s216_s9 + $0x10] sm:$0xff]  ;;  %v231_v7 = vld [vmem:[%s964_s21] sm:$0xff]  ;;  %v232_v9 = vld [vmem:[%s964_s21 + $0x8] sm:$0xff]  ;;  %s1003_s5 = scalar_lea.vmem %s1139_s2, %s679_s24  ;;  %s1013_s4 = scalar_lea.vmem [#allocation2], %s647_s6 }
  0x1e   : > { %v683_v6 = vpack.c.bf16 %v249_v5, %v247_v3  ;;  %v239_v8 = vld [vmem:[%s964_s21 + $0x40] sm:$0xff]  ;;  %v240_v10 = vld [vmem:[%s964_s21 + $0x48] sm:$0xff]  ;;  %v233_v11 = vld [vmem:[%s964_s21 + $0x10] sm:$0xff]  ;;  %s539_s9 = sadd.s32 %s680_s7, %s674_s8  ;;  %s542_s16 = sshll.u32 %s1013_s4, 4  ;;  %s1077_s16 = int_to_ptr.vmem [resolvable:$true] %s542_s16 }
  0x1f   : > { %682 = vmatprep.subr.bf16.mxu0 %v681_v4  ;;  %685 = vmatprep.subr.bf16.mxu1 %v681_v4  ;;  %v241_v12 = vld [vmem:[%s964_s21 + $0x50] sm:$0xff]  ;;  %v234_v13 = vld [vmem:[%s964_s21 + $0x18] sm:$0xff]  ;;  %v235_v15 = vld [vmem:[%s964_s21 + $0x20] sm:$0xff]  ;;  %s675_s15 = sshll.u32 %s539_s9, 7  ;;  %s761_s24 = scalar_lea.vmem %s1077_s16, 4096 }
  0x20   : > { %684 = vmatpush1.bf16.msra.mxu0 %v683_v6  ;;  %686 = vmatpush1.bf16.msra.mxu1 %v683_v6  ;;  %v242_v14 = vld [vmem:[%s964_s21 + $0x58] sm:$0xff]  ;;  %v243_v16 = vld [vmem:[%s964_s21 + $0x60] sm:$0xff]  ;;  %v236_v17 = vld [vmem:[%s964_s21 + $0x28] sm:$0xff]  ;;  %s1075_s20 = scalar_lea.hbm %s1140_s3, %s675_s15  ;;  %p762_p0 = scmp.ne.s32.totalorder %s1077_s16, %s761_s24 }
  0x21   : > { %v244_v18 = vld [vmem:[%s964_s21 + $0x68] sm:$0xff]  ;;  %v237_v19 = vld [vmem:[%s964_s21 + $0x30] sm:$0xff]  ;;  %v238_v21 = vld [vmem:[%s964_s21 + $0x38] sm:$0xff]  ;;  %p768_p4 = scmp.lt.s32.totalorder %s1077_s16, %s766_s29 }
  0x22   : > { %v245_v20 = vld [vmem:[%s964_s21 + $0x70] sm:$0xff]  ;;  %v246_v22 = vld [vmem:[%s964_s21 + $0x78] sm:$0xff]  ;;  %v251_v23 = vld [vmem:[%s1003_s5] sm:$0xff]  ;;  %s1085_s21 = scalar_lea.sflag [#allocation3], %s209_s27  ;;  %p763_p1 = pnand %p762_p0, %p932_p3 }
  0x23   : > { %655 = vmatmul.mubr.msk.f32.vlgmr.msra.gmra.mrb[0].mxu0 %vm283_vm0, %v231_v7  ;;  %663 = vmatmul.mubr.msk.f32.vlgmr.msra.gmra.mrb[0].mxu1 %vm283_vm0, %v239_v8  ;;  %v267_v24 = vld [vmem:[%s1003_s5 + $0x80] sm:$0xff]  ;;  %v252_v25 = vld [vmem:[%s1003_s5 + $0x8] sm:$0xff]  ;;  %v253_v35 = vld [vmem:[%s1003_s5 + $0x10] sm:$0xff] }
  0x24   : > { %402 = vmatprep.mubr.f32.mxu0 %v857_v0  ;;  %450 = vmatprep.mubr.f32.mxu1 %v857_v0  ;;  %v268_v26 = vld [vmem:[%s1003_s5 + $0x88] sm:$0xff]  ;;  %v269_v36 = vld [vmem:[%s1003_s5 + $0x90] sm:$0xff]  ;;  %v254_v37 = vld [vmem:[%s1003_s5 + $0x18] sm:$0xff]  ;;  %p764_p2 = pneg %p763_p1 }
  0x25   : > { %v270_v38 = vld [vmem:[%s1003_s5 + $0x98] sm:$0xff]  ;;  %v255_v47 = vld [vmem:[%s1003_s5 + $0x20] sm:$0xff]  ;;  %v256_v49 = vld [vmem:[%s1003_s5 + $0x28] sm:$0xff] }
  0x26   : > { %v271_v48 = vld [vmem:[%s1003_s5 + $0xa0] sm:$0xff]  ;;  %v272_v50 = vld [vmem:[%s1003_s5 + $0xa8] sm:$0xff]  ;;  %v257_v59 = vld [vmem:[%s1003_s5 + $0x30] sm:$0xff] }
  0x27   : > { %656 = vmatmul.mubr.msk.f32.gmra.mrb[2].mxu0 %vm283_vm0, %v232_v9  ;;  %664 = vmatmul.mubr.msk.f32.gmra.mrb[2].mxu1 %vm283_vm0, %v240_v10  ;;  %v273_v60 = vld [vmem:[%s1003_s5 + $0xb0] sm:$0xff]  ;;  %v258_v61 = vld [vmem:[%s1003_s5 + $0x38] sm:$0xff]  ;;  %v259_v7 = vld [vmem:[%s1003_s5 + $0x40] sm:$0xff] }
  0x28   : > { %408 = vmatprep.mubr.f32.mxu0 %v857_v0  ;;  %456 = vmatprep.mubr.f32.mxu1 %v857_v0  ;;  %v274_v62 = vld [vmem:[%s1003_s5 + $0xb8] sm:$0xff]  ;;  %v275_v8 = vld [vmem:[%s1003_s5 + $0xc0] sm:$0xff]  ;;  %v260_v9 = vld [vmem:[%s1003_s5 + $0x48] sm:$0xff] }
  0x29   : > { %v276_v10 = vld [vmem:[%s1003_s5 + $0xc8] sm:$0xff] }
  0x2b   : > { %657 = vmatmul.mubr.msk.f32.gmra.mrb[4].mxu0 %vm283_vm0, %v233_v11  ;;  %665 = vmatmul.mubr.msk.f32.gmra.mrb[4].mxu1 %vm283_vm0, %v241_v12 }
  0x2c   : > { %414 = vmatprep.mubr.f32.mxu0 %v857_v0  ;;  %462 = vmatprep.mubr.f32.mxu1 %v857_v0 }
  0x2f   : > { %658 = vmatmul.mubr.msk.f32.gmra.mrb[6].mxu0 %vm283_vm0, %v234_v13  ;;  %666 = vmatmul.mubr.msk.f32.gmra.mrb[6].mxu1 %vm283_vm0, %v242_v14 }
  0x30   : > { %420 = vmatprep.mubr.f32.mxu0 %v857_v0  ;;  %468 = vmatprep.mubr.f32.mxu1 %v857_v0 }
  0x33   : > { %659 = vmatmul.mubr.msk.f32.gmra.mrb[8].mxu0 %vm283_vm0, %v235_v15  ;;  %667 = vmatmul.mubr.msk.f32.gmra.mrb[8].mxu1 %vm283_vm0, %v243_v16 }
  0x34   : > { %426 = vmatprep.mubr.f32.mxu0 %v857_v0  ;;  %474 = vmatprep.mubr.f32.mxu1 %v857_v0 }
  0x37   : > { %660 = vmatmul.mubr.msk.f32.gmra.mrb[10].mxu0 %vm283_vm0, %v236_v17  ;;  %668 = vmatmul.mubr.msk.f32.gmra.mrb[10].mxu1 %vm283_vm0, %v244_v18 }
  0x38   : > { %432 = vmatprep.mubr.f32.mxu0 %v857_v0  ;;  %480 = vmatprep.mubr.f32.mxu1 %v857_v0 }
  0x3b   : > { %661 = vmatmul.mubr.msk.f32.gmra.mrb[12].mxu0 %vm283_vm0, %v237_v19  ;;  %669 = vmatmul.mubr.msk.f32.gmra.mrb[12].mxu1 %vm283_vm0, %v245_v20  ;;  %v261_v19 = vld [vmem:[%s1003_s5 + $0x50] sm:$0xff] }
  0x3c   : > { %438 = vmatprep.mubr.f32.mxu0 %v857_v0  ;;  %486 = vmatprep.mubr.f32.mxu1 %v857_v0  ;;  %v277_v20 = vld [vmem:[%s1003_s5 + $0xd0] sm:$0xff] }
  0x3f   : > { %662 = vmatmul.mubr.msk.f32.gmra.mrb[14].mxu0 %vm283_vm0, %v238_v21  ;;  %670 = vmatmul.mubr.msk.f32.gmra.mrb[14].mxu1 %vm283_vm0, %v246_v22  ;;  %v262_v21 = vld [vmem:[%s1003_s5 + $0x58] sm:$0xff] }
  0x40   : > { %v278_v22 = vld [vmem:[%s1003_s5 + $0xd8] sm:$0xff] }
  0xf6   : > { %v398_v27 = vpop.f32.mrb[0].mxu0  ;;  %v446_v28 = vpop.f32.mrb[0].mxu1 }
  0xf7   : > { %v399_v29 = vadd.f32 %v398_v27, %v251_v23  ;;  %v447_v30 = vadd.f32 %v446_v28, %v267_v24  ;;  %v400_v31 = vpop.f32.mrb[1].mxu0  ;;  %v448_v32 = vpop.f32.mrb[1].mxu1 }
  0xf8   : > { %v401_v33 = vadd.f32 %v400_v31, %v252_v25  ;;  %v449_v34 = vadd.f32 %v448_v32, %v268_v26  ;;  %v263_v31 = vld [vmem:[%s1003_s5 + $0x60] sm:$0xff] }
  0xf9   : > { %493 = vst [vmem:[%s1013_s4] sm:$0xff] %v399_v29  ;;  %509 = vst [vmem:[%s1013_s4 + $0x80] sm:$0xff] %v447_v30  ;;  %v279_v32 = vld [vmem:[%s1003_s5 + $0xe0] sm:$0xff] }
  0xfa   : > { %494 = vst [vmem:[%s1013_s4 + $0x8] sm:$0xff] %v401_v33  ;;  %510 = vst [vmem:[%s1013_s4 + $0x88] sm:$0xff] %v449_v34  ;;  %v404_v39 = vpop.f32.mrb[2].mxu0  ;;  %v452_v40 = vpop.f32.mrb[2].mxu1  ;;  %v264_v33 = vld [vmem:[%s1003_s5 + $0x68] sm:$0xff] }
  0xfb   : > { %v405_v41 = vadd.f32 %v404_v39, %v253_v35  ;;  %v453_v42 = vadd.f32 %v452_v40, %v269_v36  ;;  %v406_v43 = vpop.f32.mrb[3].mxu0  ;;  %v454_v44 = vpop.f32.mrb[3].mxu1  ;;  %v280_v34 = vld [vmem:[%s1003_s5 + $0xe8] sm:$0xff] }
  0xfc   : > { %v407_v45 = vadd.f32 %v406_v43, %v254_v37  ;;  %v455_v46 = vadd.f32 %v454_v44, %v270_v38  ;;  %v265_v43 = vld [vmem:[%s1003_s5 + $0x70] sm:$0xff] }
  0xfd   : > { %495 = vst [vmem:[%s1013_s4 + $0x10] sm:$0xff] %v405_v41  ;;  %511 = vst [vmem:[%s1013_s4 + $0x90] sm:$0xff] %v453_v42  ;;  %v281_v44 = vld [vmem:[%s1003_s5 + $0xf0] sm:$0xff] }
  0xfe   : > { %496 = vst [vmem:[%s1013_s4 + $0x18] sm:$0xff] %v407_v45  ;;  %512 = vst [vmem:[%s1013_s4 + $0x98] sm:$0xff] %v455_v46  ;;  %v410_v51 = vpop.f32.mrb[4].mxu0  ;;  %v458_v52 = vpop.f32.mrb[4].mxu1  ;;  %v266_v45 = vld [vmem:[%s1003_s5 + $0x78] sm:$0xff] }
  0xff   : > { %v411_v53 = vadd.f32 %v410_v51, %v255_v47  ;;  %v459_v54 = vadd.f32 %v458_v52, %v271_v48  ;;  %v412_v55 = vpop.f32.mrb[5].mxu0  ;;  %v460_v56 = vpop.f32.mrb[5].mxu1  ;;  %v282_v46 = vld [vmem:[%s1003_s5 + $0xf8] sm:$0xff]  ;;  %s767_s5 = scalar_lea.vmem %s766_s29, 8192 }
 0x100   : > { %v413_v57 = vadd.f32 %v412_v55, %v256_v49  ;;  %v461_v58 = vadd.f32 %v460_v56, %v272_v50  ;;  %p769_p5 = scmp.lt.s32.totalorder %s767_s5, %s761_s24 }
 0x101   : > { %497 = vst [vmem:[%s1013_s4 + $0x20] sm:$0xff] %v411_v53  ;;  %513 = vst [vmem:[%s1013_s4 + $0xa0] sm:$0xff] %v459_v54 }
 0x102   : > { %498 = vst [vmem:[%s1013_s4 + $0x28] sm:$0xff] %v413_v57  ;;  %514 = vst [vmem:[%s1013_s4 + $0xa8] sm:$0xff] %v461_v58  ;;  %v416_v63 = vpop.f32.mrb[6].mxu0  ;;  %v464_v0 = vpop.f32.mrb[6].mxu1  ;;  %p770_p6 = por %p769_p5, %p768_p4 }
 0x103   : > { %v417_v1 = vadd.f32 %v416_v63, %v257_v59  ;;  %v465_v2 = vadd.f32 %v464_v0, %v273_v60  ;;  %v418_v3 = vpop.f32.mrb[7].mxu0  ;;  %v466_v4 = vpop.f32.mrb[7].mxu1 }
 0x104   : > { %v419_v5 = vadd.f32 %v418_v3, %v258_v61  ;;  %v467_v6 = vadd.f32 %v466_v4, %v274_v62  ;;  %p771_p7 = pnand %p770_p6, %p764_p2 }
 0x105   : > { %499 = vst [vmem:[%s1013_s4 + $0x30] sm:$0xff] %v417_v1  ;;  %515 = vst [vmem:[%s1013_s4 + $0xb0] sm:$0xff] %v465_v2 }
 0x106   : > { %500 = vst [vmem:[%s1013_s4 + $0x38] sm:$0xff] %v419_v5  ;;  %516 = vst [vmem:[%s1013_s4 + $0xb8] sm:$0xff] %v467_v6  ;;  %v422_v11 = vpop.f32.mrb[8].mxu0  ;;  %v470_v12 = vpop.f32.mrb[8].mxu1 }
 0x107   : > { %v423_v13 = vadd.f32 %v422_v11, %v259_v7  ;;  %v471_v14 = vadd.f32 %v470_v12, %v275_v8  ;;  %v424_v15 = vpop.f32.mrb[9].mxu0  ;;  %v472_v16 = vpop.f32.mrb[9].mxu1 }
 0x108   : > { %v425_v17 = vadd.f32 %v424_v15, %v260_v9  ;;  %v473_v18 = vadd.f32 %v472_v16, %v276_v10 }
 0x109   : > { %501 = vst [vmem:[%s1013_s4 + $0x40] sm:$0xff] %v423_v13  ;;  %517 = vst [vmem:[%s1013_s4 + $0xc0] sm:$0xff] %v471_v14 }
 0x10a   : > { %502 = vst [vmem:[%s1013_s4 + $0x48] sm:$0xff] %v425_v17  ;;  %518 = vst [vmem:[%s1013_s4 + $0xc8] sm:$0xff] %v473_v18  ;;  %v428_v23 = vpop.f32.mrb[10].mxu0  ;;  %v476_v24 = vpop.f32.mrb[10].mxu1 }
 0x10b   : > { %v429_v25 = vadd.f32 %v428_v23, %v261_v19  ;;  %v477_v26 = vadd.f32 %v476_v24, %v277_v20  ;;  %v430_v27 = vpop.f32.mrb[11].mxu0  ;;  %v478_v28 = vpop.f32.mrb[11].mxu1 }
 0x10c   : > { %v431_v29 = vadd.f32 %v430_v27, %v262_v21  ;;  %v479_v30 = vadd.f32 %v478_v28, %v278_v22 }
 0x10d   : > { %503 = vst [vmem:[%s1013_s4 + $0x50] sm:$0xff] %v429_v25  ;;  %519 = vst [vmem:[%s1013_s4 + $0xd0] sm:$0xff] %v477_v26 }
 0x10e   : > { %504 = vst [vmem:[%s1013_s4 + $0x58] sm:$0xff] %v431_v29  ;;  %520 = vst [vmem:[%s1013_s4 + $0xd8] sm:$0xff] %v479_v30  ;;  %v434_v35 = vpop.f32.mrb[12].mxu0  ;;  %v482_v36 = vpop.f32.mrb[12].mxu1 }
 0x10f   : > { %v435_v37 = vadd.f32 %v434_v35, %v263_v31  ;;  %v483_v38 = vadd.f32 %v482_v36, %v279_v32  ;;  %v436_v39 = vpop.f32.mrb[13].mxu0  ;;  %v484_v40 = vpop.f32.mrb[13].mxu1 }
 0x110   : > { %v437_v41 = vadd.f32 %v436_v39, %v264_v33  ;;  %v485_v42 = vadd.f32 %v484_v40, %v280_v34 }
 0x111   : > { %505 = vst [vmem:[%s1013_s4 + $0x60] sm:$0xff] %v435_v37  ;;  %521 = vst [vmem:[%s1013_s4 + $0xe0] sm:$0xff] %v483_v38 }
 0x112   : > { %506 = vst [vmem:[%s1013_s4 + $0x68] sm:$0xff] %v437_v41  ;;  %522 = vst [vmem:[%s1013_s4 + $0xe8] sm:$0xff] %v485_v42  ;;  %v440_v47 = vpop.f32.mrb[14].mxu0  ;;  %v488_v48 = vpop.f32.mrb[14].mxu1 }
 0x113   : > { %v441_v49 = vadd.f32 %v440_v47, %v265_v43  ;;  %v489_v50 = vadd.f32 %v488_v48, %v281_v44  ;;  %v442_v51 = vpop.f32.mrb[15].mxu0  ;;  %v490_v52 = vpop.f32.mrb[15].mxu1 }
 0x114   : > { %v443_v53 = vadd.f32 %v442_v51, %v266_v45  ;;  %v491_v54 = vadd.f32 %v490_v52, %v282_v46 }
 0x115   : > { %507 = vst [vmem:[%s1013_s4 + $0x70] sm:$0xff] %v441_v49  ;;  %523 = vst [vmem:[%s1013_s4 + $0xf0] sm:$0xff] %v489_v50 }
 0x116   : > { %508 = vst [vmem:[%s1013_s4 + $0x78] sm:$0xff] %v443_v53  ;;  %524 = vst [vmem:[%s1013_s4 + $0xf8] sm:$0xff] %v491_v54 }
 0x117   : > { %774 = shalt.err (!%p771_p7)
}
 0x118   : > { %s775_s27 = scalar_lea.hbm %s1075_s20, 4096  ;;  %s779_s7 = scalar_lea.hbm %s1140_s3, 16384 }
 0x119   : > { %p776_p9 = scmp.ne.s32.totalorder %s1075_s20, %s775_s27  ;;  %p780_p12 = scmp.lt.u32.totalorder %s1075_s20, %s1140_s3 }
 0x11a   : > { %p781_p13 = scmp.lt.u32.totalorder %s779_s7, %s775_s27  ;;  %p783_p1 = scmp.lt.u32.totalorder %s775_s27, %s1075_s20 }
 0x11b   : > { %p777_p10 = pnand %p776_p9, %p932_p3 }
 0x11c   : > { %p782_p0 = por %p781_p13, %p780_p12 }
 0x11d   : > { %p778_p11 = pneg %p777_p10 }
 0x11e   : > { %p784_p2 = por %p783_p1, %p782_p0 }
 0x120   : > { %p785_p4 = pnand %p784_p2, %p778_p11 }
 0x122   : > { %788 = shalt.err (!%p785_p4)
}
 0x123   : > { %s859_s15 = smov 256   ;;  %s860_s10 = smov 16  }
 0x124   : > { %687 = dma.vmem_to_hbm [thread:$0]  (%p932_p3), %s1077_s16, 4096, %s1075_s20, %s1085_s21, %s859_s15, %s859_s15, %s860_s10  }
 0x125 PF: > { %p693_p5 = scmp.ge.s32.totalorder %s855_s19, 2  ;;  %s557_s11 = sand.u32 1, %s827_s12  }
 0x126   : > { %s558_s24 = scalar_lea.sflag [#allocation3], %s557_s11 }
 0x127   : > { %p690_p6 = pnand %p693_p5, %p941_p8 }
 0x129   : > { %822 = dma.done.wait (!%p690_p6), %s558_s24, 4096  }
 0x12a   : > { %824 = vsyncadd (!%p690_p6), %s558_s24, 4294963200  ;;  %s16_s19 = sadd.s32 1, %s855_s19   ;;  %s1143_s12 = smov %s831_s13 }
 0x12b   : > { %p13_p7 = scmp.ge.s32.totalorder %s16_s19, 6   ;;  %s1144_s13 = smov %s835_s14 }
 0x12c   : > { %s1145_s14 = smov %s950_s30  ;;  %s1146_s15 = smov %s847_s17 }
 0x12d   : > { %s1147_s16 = smov %s851_s18  ;;  %s1148_s17 = smov %s1151_s22 }
 0x12e   : > { %s1149_s18 = smov %s1155_s23  ;;  %15 = sbr.rel (!%p13_p7) target bundleno = 5 (0x5), region = 73 }
 0x135   :  { %563 = vsyncpa [#allocation3], 1 }
 0x136   :  { %565 = vsyncpa [#allocation3 + $0x1], 1 }

</bundles_post_ra>
